<compile_context>
chip_gen: v5e
topology: v5e:2x2
jax: 0.10.0
libtpu: 0.0.40
codegen_flags: <defaults>
</compile_context>

<pallas_src>
import jax
import jax.numpy as jnp
from jax.experimental import pallas as pl
from jax.experimental.pallas import tpu as pltpu

_VMEM_BUDGET = 40 * 1024 * 1024      # tile-planning budget
_VMEM_LIMIT = 48 * 1024 * 1024       # scoped-VMEM limit (safe on v5e/v6e/v7x)


def _round_up(a, b):
    return (a + b - 1) // b * b


def _sublane(dtype):
    # Min sublane multiple for the second-minor block dim:
    # 8 for 32-bit, 16 for bf16, 32 for int8.
    return max(8, 32 // jnp.dtype(dtype).itemsize)


def _choose_tile(dim, unit, cap):
    """Pick a tile for `dim`.

    - full dim when it fits (a block equal to the full array dim is exempt
      from the (8,128) alignment rule -> no padding),
    - else the largest unit-aligned divisor <= cap (no padding),
    - else a ceil-split so padding waste is < one `unit` per block.
    Returns (tile, padded_dim).
    """
    cap = max(unit, cap // unit * unit)
    if dim <= cap:
        return dim, dim
    t = cap
    while t >= unit:
        if dim % t == 0:
            return t, dim
        t -= unit
    nblk = -(-dim // cap)
    t = _round_up(-(-dim // nblk), unit)
    return t, t * nblk


# ----------------------------------------------------------------------------
# Kernels
# ----------------------------------------------------------------------------
def _fused_stacked_linear_kernel(x_ref, w_ref, b_ref, o_ref, acc_ref):
    # x_ref: (tm, tk) tile of [B*S, H];  w_ref: (tk, tn) tile of [H, N*O]
    # b_ref: (1, tn);  o_ref/acc_ref: (tm, tn)
    k = pl.program_id(2)

    @pl.when(k == 0)
    def _init():
        # Bias folded into the accumulator init (no epilogue add).
        acc_ref[...] = jnp.broadcast_to(
            b_ref[...].astype(jnp.float32), acc_ref.shape)

    acc_ref[...] += jnp.dot(
        x_ref[...], w_ref[...], preferred_element_type=jnp.float32)

    @pl.when(k == pl.num_programs(2) - 1)
    def _finalize():
        o_ref[...] = acc_ref[...].astype(o_ref.dtype)


def _direct_stacked_linear_kernel(x_ref, w_ref, b_ref, o_ref, acc_ref):
    # x_ref: (1, ts, tk);  w_ref: (1, tk, O);  b_ref: (1, 1, O)
    # o_ref: (1, 1, ts, O);  acc_ref: (ts, O)
    k = pl.program_id(3)

    @pl.when(k == 0)
    def _init():
        acc_ref[...] = jnp.broadcast_to(
            b_ref[0].astype(jnp.float32), acc_ref.shape)

    acc_ref[...] += jnp.dot(
        x_ref[0], w_ref[0], preferred_element_type=jnp.float32)

    @pl.when(k == pl.num_programs(3) - 1)
    def _finalize():
        o_ref[0, 0] = acc_ref[...].astype(o_ref.dtype)


# ----------------------------------------------------------------------------
# One-time parameter layout prep (hoisted out of the per-call hot path).
# ----------------------------------------------------------------------------
def prepare_params(w_stack, b_stack):
    """w_stack: [N, H, O] (nn.Linear weights pre-transposed), b_stack: [N, O]."""
    N, H, O = w_stack.shape
    if O % 128 == 0:
        # Direct permuted-output path: weights stay [N, H, O], bias [N, 1, O].
        return dict(mode="direct", N=N, O=O,
                    w=w_stack, b=b_stack.reshape(N, 1, O))
    # Fused-fanout path: stack the N output dims along the lane axis and pad
    # the fan-out to a 128-lane multiple ONCE here, so the per-call path never
    # transposes or pads weights and the kernel's output stores are unmasked.
    NO = N * O
    NOp = _round_up(NO, 128)
    w2 = jnp.transpose(w_stack, (1, 0, 2)).reshape(H, NO)
    b2 = b_stack.reshape(1, NO)
    if NOp != NO:
        w2 = jnp.pad(w2, ((0, 0), (0, NOp - NO)))
        b2 = jnp.pad(b2, ((0, 0), (0, NOp - NO)))
    return dict(mode="fused", N=N, O=O, w=w2, b=b2)


# ----------------------------------------------------------------------------
# Wrappers
# ----------------------------------------------------------------------------
def _stacked_linear_direct(x, w_stack, b_rs):
    B, S, H = x.shape
    N, _, O = w_stack.shape
    dtype = x.dtype
    isz = jnp.dtype(dtype).itemsize
    sub = _sublane(dtype)

    # S tile (sublane of x / out blocks); bounded so the out/acc slabs stay
    # small even for very large O.
    ts_cap = max(sub, min(512, _VMEM_BUDGET // (3 * O * max(isz, 4)) // sub * sub))
    ts, Sp = _choose_tile(S, sub, ts_cap)

    # H tile; bounded by the double-buffered-VMEM budget.
    fixed = 2 * ts * O * isz + ts * O * 4 + 2 * O * isz
    per_k = 2 * (ts + O) * isz
    k_cap = max(128, min(2048, (_VMEM_BUDGET - fixed) // per_k // 128 * 128))
    tk, Hp = _choose_tile(H, 128, k_cap)

    if (Sp, Hp) != (S, H):
        x = jnp.pad(x, ((0, 0), (0, Sp - S), (0, Hp - H)))
    if Hp != H:
        w_stack = jnp.pad(w_stack, ((0, 0), (0, Hp - H), (0, 0)))

    # Grid (b, s-tile, n, k): weights are reused consecutively across n when
    # H fits one K tile, and x is never re-read more than Hp//tk times.
    grid = (B, Sp // ts, N, Hp // tk)

    cost = pl.CostEstimate(
        flops=2 * B * N * S * H * O,
        transcendentals=0,
        bytes_accessed=(B * S * H + N * H * O + N * O + B * N * S * O) * isz)

    out = pl.pallas_call(
        _direct_stacked_linear_kernel,
        out_shape=jax.ShapeDtypeStruct((B, N, Sp, O), dtype),
        grid_spec=pltpu.PrefetchScalarGridSpec(
            num_scalar_prefetch=0,
            grid=grid,
            in_specs=[
                pl.BlockSpec((1, ts, tk), lambda b, si, n, k: (b, si, k)),
                pl.BlockSpec((1, tk, O), lambda b, si, n, k: (n, k, 0)),
                pl.BlockSpec((1, 1, O), lambda b, si, n, k: (n, 0, 0)),
            ],
            out_specs=pl.BlockSpec((1, 1, ts, O),
                                   lambda b, si, n, k: (b, n, si, 0)),
            scratch_shapes=[pltpu.VMEM((ts, O), jnp.float32)],
        ),
        compiler_params=pltpu.CompilerParams(
            dimension_semantics=("parallel", "parallel", "parallel",
                                 "arbitrary"),
            vmem_limit_bytes=_VMEM_LIMIT,
        ),
        cost_estimate=cost,
    )(x, w_stack, b_rs)

    if Sp != S:
        out = out[:, :, :S, :]
    return out


def _stacked_linear_fused(x, w2, b2, N, O):
    B, S, H = x.shape
    M, K = B * S, H
    NO = N * O
    NOp = w2.shape[1]                 # already a 128 multiple (prepare_params)
    dtype = x.dtype
    isz = jnp.dtype(dtype).itemsize
    sub = _sublane(dtype)

    x2 = x.reshape(M, K)

    # Lane tile over the fused fan-out: collapse the j axis when it fits, so
    # the activation matrix is streamed from HBM exactly once.
    if NOp <= 1024:
        tn = NOp
    else:
        tn, _ = _choose_tile(NOp, 128, 512)

    tk, Kp = _choose_tile(K, 128, 1024)
    tm, Mp = _choose_tile(M, sub, 512)

    # Keep >= 2 i-blocks when the j axis collapsed so a second TensorCore
    # (v7x megacore) still gets work — only when it stays aligned & unpadded.
    if tn == NOp and Mp == tm and Mp > sub:
        half = Mp // 2
        if half % sub == 0 and Mp % half == 0:
            tm = half

    if (Mp, Kp) != (M, K):
        x2 = jnp.pad(x2, ((0, Mp - M), (0, Kp - K)))
    if Kp != K:
        w2 = jnp.pad(w2, ((0, Kp - K), (0, 0)))

    grid = (Mp // tm, NOp // tn, Kp // tk)

    cost = pl.CostEstimate(
        flops=2 * M * K * NO,
        transcendentals=0,
        bytes_accessed=(M * K + K * NO + NO + M * NO) * isz)

    out2 = pl.pallas_call(
        _fused_stacked_linear_kernel,
        out_shape=jax.ShapeDtypeStruct((Mp, NOp), dtype),
        grid_spec=pltpu.PrefetchScalarGridSpec(
            num_scalar_prefetch=0,
            grid=grid,
            in_specs=[
                pl.BlockSpec((tm, tk), lambda i, j, k: (i, k)),   # x tile
                pl.BlockSpec((tk, tn), lambda i, j, k: (k, j)),   # fused W
                pl.BlockSpec((1, tn), lambda i, j, k: (0, j)),    # bias
            ],
            out_specs=pl.BlockSpec((tm, tn), lambda i, j, k: (i, j)),
            scratch_shapes=[pltpu.VMEM((tm, tn), jnp.float32)],
        ),
        compiler_params=pltpu.CompilerParams(
            dimension_semantics=("parallel", "parallel", "arbitrary"),
            vmem_limit_bytes=_VMEM_LIMIT,
        ),
        cost_estimate=cost,
    )(x2, w2, b2)

    out2 = out2[:M, :NO]                       # drop pad rows / lanes
    out = out2.reshape(B, S, N, O)             # [B, S, N, O]
    return jnp.transpose(out, (0, 2, 1, 3))    # [B, N, S, O]


def stacked_linear(x, params):
    """x: [B, S, H], params from prepare_params() -> [B, N, S, O]."""
    if params["mode"] == "direct":
        return _stacked_linear_direct(x, params["w"], params["b"])
    return _stacked_linear_fused(x, params["w"], params["b"],
                                 params["N"], params["O"])


# ----------------------------------------------------------------------------
# Test
# ----------------------------------------------------------------------------
if __name__ == "__main__":
    def run_case(B, N, S, H, O, key):
        kx, kw, kb = jax.random.split(key, 3)
        x = jax.random.normal(kx, (B, S, H), dtype=jnp.float32)
        bound = 1.0 / (H ** 0.5)
        # nn.Linear weights [O, H] / [O], stored pre-transposed as [N, H, O].
        w_stack = jax.random.uniform(kw, (N, H, O), jnp.float32, -bound, bound)
        b_stack = jax.random.uniform(kb, (N, O), jnp.float32, -bound, bound)

        params = prepare_params(w_stack, b_stack)   # one-time layout prep
        out = jax.block_until_ready(stacked_linear(x, params))

        # Reference of the torch forward: stack(dim=0) then permute(1,0,2,3).
        ref = jnp.einsum("bsh,nho->bnso", x, w_stack) \
            + b_stack[None, :, None, :]
        assert out.shape == (B, N, S, O)
        assert jnp.allclose(out, ref, atol=1e-4, rtol=1e-4)

    k1, k2 = jax.random.split(jax.random.PRNGKey(0))
    run_case(B=2, N=3, S=8, H=32, O=32, key=k1)      # ragged O -> fused path
    run_case(B=2, N=2, S=16, H=128, O=128, key=k2)   # 128-aligned O -> direct

    print("KERNEL_OK")
</pallas_src>

<mosaic_0001>
module attributes {stable_mosaic.version = 11 : i64} {
  func.func @_fused_stacked_linear_kernel(%arg0: i32, %arg1: i32, %arg2: i32, %arg3: memref<8x32xf32, #tpu.memory_space<vmem>>, %arg4: memref<32x128xf32, #tpu.memory_space<vmem>>, %arg5: memref<1x128xf32, #tpu.memory_space<vmem>>, %arg6: memref<8x128xf32, #tpu.memory_space<vmem>>, %arg7: memref<8x128xf32, #tpu.memory_space<vmem>>) attributes {dimension_semantics = [#tpu.dimension_semantics<parallel>, #tpu.dimension_semantics<parallel>, #tpu.dimension_semantics<arbitrary>], iteration_bounds = array<i64: 2, 1, 1>, scalar_prefetch = 0 : i64, scratch_operands = 1 : i64, tpu.core_type = #tpu.core_type<tc>, window_params = [{transform_indices = @transform_0, window_bounds = array<i64: 8, 32>}, {transform_indices = @transform_1, window_bounds = array<i64: 32, 128>}, {transform_indices = @transform_2, window_bounds = array<i64: 1, 128>}, {transform_indices = @transform_3, window_bounds = array<i64: 8, 128>}]} {
    %c0_i32 = arith.constant 0 : i32
    %0 = arith.cmpi eq, %arg2, %c0_i32 : i32
    %1 = arith.extui %0 : i1 to i32
    %c0_i32_0 = arith.constant 0 : i32
    %2 = arith.cmpi ne, %1, %c0_i32_0 : i32
    scf.if %2 {
      %c0_10 = arith.constant 0 : index
      %c0_11 = arith.constant 0 : index
      %12 = vector.load %arg5[%c0_10, %c0_11] : memref<1x128xf32, #tpu.memory_space<vmem>>, vector<1x128xf32>
      %13 = vector.shape_cast %12 : vector<1x128xf32> to vector<1x128xf32>
      %14 = vector.broadcast %13 : vector<1x128xf32> to vector<8x128xf32>
      %c0_12 = arith.constant 0 : index
      %c0_13 = arith.constant 0 : index
      %15 = vector.load %arg7[%c0_12, %c0_13] : memref<8x128xf32, #tpu.memory_space<vmem>>, vector<8x128xf32>
      tpu.vector_store %arg7[%c0_12, %c0_13], %14 {strides = array<i32>} : memref<8x128xf32, #tpu.memory_space<vmem>>, vector<8x128xf32>,
    } else {
    }
    %c0 = arith.constant 0 : index
    %c0_1 = arith.constant 0 : index
    %3 = vector.load %arg7[%c0, %c0_1] : memref<8x128xf32, #tpu.memory_space<vmem>>, vector<8x128xf32>
    %c0_2 = arith.constant 0 : index
    %c0_3 = arith.constant 0 : index
    %4 = vector.load %arg3[%c0_2, %c0_3] : memref<8x32xf32, #tpu.memory_space<vmem>>, vector<8x32xf32>
    %c0_4 = arith.constant 0 : index
    %c0_5 = arith.constant 0 : index
    %5 = vector.load %arg4[%c0_4, %c0_5] : memref<32x128xf32, #tpu.memory_space<vmem>>, vector<32x128xf32>
    %cst = arith.constant dense<0.000000e+00> : vector<8x128xf32>
    %6 = tpu.matmul %4, %5, %cst {dimension_numbers = #tpu.dot_dimension_numbers<[1], [0], [0], [1], [0, 0, 1, 1], [], []>} : vector<8x32xf32>, vector<32x128xf32>, vector<8x128xf32> -> vector<8x128xf32>
    %7 = arith.addf %3, %6 : vector<8x128xf32>
    %c0_6 = arith.constant 0 : index
    %c0_7 = arith.constant 0 : index
    %8 = vector.load %arg7[%c0_6, %c0_7] : memref<8x128xf32, #tpu.memory_space<vmem>>, vector<8x128xf32>
    tpu.vector_store %arg7[%c0_6, %c0_7], %7 {strides = array<i32>} : memref<8x128xf32, #tpu.memory_space<vmem>>, vector<8x128xf32>,
    %c0_i32_8 = arith.constant 0 : i32
    %9 = arith.cmpi eq, %arg2, %c0_i32_8 : i32
    %10 = arith.extui %9 : i1 to i32
    %c0_i32_9 = arith.constant 0 : i32
    %11 = arith.cmpi ne, %10, %c0_i32_9 : i32
    scf.if %11 {
      %c0_10 = arith.constant 0 : index
      %c0_11 = arith.constant 0 : index
      %12 = vector.load %arg7[%c0_10, %c0_11] : memref<8x128xf32, #tpu.memory_space<vmem>>, vector<8x128xf32>
      %c0_12 = arith.constant 0 : index
      %c0_13 = arith.constant 0 : index
      %13 = vector.load %arg6[%c0_12, %c0_13] : memref<8x128xf32, #tpu.memory_space<vmem>>, vector<8x128xf32>
      tpu.vector_store %arg6[%c0_12, %c0_13], %12 {strides = array<i32>} : memref<8x128xf32, #tpu.memory_space<vmem>>, vector<8x128xf32>,
    } else {
    }
    return
  }
  func.func @transform_0(%arg0: i32, %arg1: i32, %arg2: i32) -> (i32, i32) {
    %c0_i32 = arith.constant 0 : i32
    return %arg0, %arg2 : i32, i32
  }
  func.func @transform_1(%arg0: i32, %arg1: i32, %arg2: i32) -> (i32, i32) {
    %c0_i32 = arith.constant 0 : i32
    return %arg2, %arg1 : i32, i32
  }
  func.func @transform_2(%arg0: i32, %arg1: i32, %arg2: i32) -> (i32, i32) {
    %c0_i32 = arith.constant 0 : i32
    %c0_i32_0 = arith.constant 0 : i32
    return %c0_i32, %arg1 : i32, i32
  }
  func.func @transform_3(%arg0: i32, %arg1: i32, %arg2: i32) -> (i32, i32) {
    %c0_i32 = arith.constant 0 : i32
    return %arg0, %arg1 : i32, i32
  }
}

</mosaic_0001>

<bundles_post_ra>
// kernel: tpu_custom_call.1
= control target key start
LH: loop header
LB: loop body
LE: loop exit
PB: predicated region body
PF: predicated region fallthrough
CT: control target
= control target key end

     0   :  { %8 = vsyncpa [#allocation4], 0  ;;  %s837_s0 = inlined_call_operand.hbm [shape: f32[16,32], index: 0, kind: input, shape index: {}]   ;;  %s838_s1 = inlined_call_operand.hbm [shape: f32[32,128], index: 1, kind: input, shape index: {}]   ;;  %s839_s2 = inlined_call_operand.vmem [shape: f32[1,128], index: 2, kind: input, shape index: {}]   ;;  %s840_s3 = inlined_call_operand.hbm [shape: f32[16,128], index: 3, kind: output, shape index: {}]  }
   0x1   :  { %10 = vsyncpa [#allocation4 + $0x1], 0 }
   0x2   :  { %11 = vsyncpa [#allocation7], 0 }
   0x3   :  { %12 = vsyncpa [#allocation5], 0 }
   0x4   :  { %14 = vsyncpa [#allocation5 + $0x1], 0  ;;  %s691_s12 = smov 0   ;;  %s693_s13 = smov 0  }
   0x5   :  { %s695_s14 = smov 0   ;;  %s697_s15 = smov 0  }
   0x6   :  { %s699_s16 = smov 0   ;;  %s701_s17 = smov 0  }
   0x7 LB: > { %s427_s18 = sadd.s32 4294967295, %s666_s17   ;;  %p429_p0 = scmp.ge.s32.totalorder %s666_s17, 1  ;;  %s666_s17 = sphi %s701_s17, %s20_s17   ;;  %s662_s16 = sphi %s699_s16, %s851_s16   ;;  %s658_s15 = sphi %s697_s15, %s850_s15   ;;  %s654_s14 = sphi %s695_s14, %s849_s14   ;;  %s650_s13 = sphi %s693_s13, %s848_s13   ;;  %s646_s12 = sphi %s691_s12, %s847_s12  }
   0x8   : > { %p723_p1 = scmp.eq.s32.totalorder %s427_s18, 0  ;;  %p154_p2 = scmp.lt.s32.totalorder %s666_s17, 3 }
   0x9   : > { %s169_s22 = sshll.u32 %s838_s1, 4  ;;  %s668_s24 = smov [#allocation6]   ;;  %s170_s22 = int_to_ptr.hbm [resolvable:$true] %s169_s22 }
   0xa   : > { %p731_p3 = pnand %p429_p0, %p154_p2  ;;  %s171_s25 = sshll.u32 %s668_s24, 4  ;;  %s172_s25 = int_to_ptr.vmem [resolvable:$true] %s171_s25 }
   0xb   : > { %p432_p6 = scmp.ge.s32.totalorder %s666_s17, 2  ;;  %s669_s26 = smov 128  }
   0xc   : > { %p452_p4 = pneg %p731_p3  ;;  %s670_s27 = smov 8  }
   0xd   : > { %s428_s28 = sadd.s32 4294967294, %s666_s17   ;;  %s39_s29 = sadd.s32 1, %s662_s16 }
   0xe   : > { %p453_p5 = pnand %p452_p4, %p723_p1  ;;  %s48_s30 = sadd.s32 1, %s654_s14 }
   0xf   : > { %p41_p7 = scmp.ge.s32.totalorder %s39_s29, 2  ;;  %p55_p8 = scmp.ne.s32.totalorder %s654_s14, %s650_s13 }
  0x10   : > { %455 = dma.hbm_to_vmem [thread:$0]  (!%p453_p5), %s170_s22, 512, %s172_s25, [#allocation7], %s669_s26, %s669_s26, %s670_s27  }
  0x11   : > { %p56_p9 = scmp.eq.s32.totalorder %s666_s17, 0  ;;  %p61_p10 = scmp.ne.s32.totalorder %s650_s13, %s646_s12 }
  0x12   : > { %s853_s29 = smov (%p41_p7, %s39_s29), 0  ;;  %p141_p13 = scmp.eq.s32.totalorder %s427_s18, 1 }
  0x13   : > { %p750_p11 = por %p56_p9, %p55_p8  ;;  %p756_p12 = por %p723_p1, %p61_p10 }
  0x14   : > { %s43_s6 = ssub.s32 %s662_s16, %s853_s29  ;;  %p147_p2 = scmp.eq.s32.totalorder %s428_s28, 1 }
  0x15   : > { %p46_p0 = scmp.eq.s32.totalorder %s43_s6, 0  ;;  %p762_p4 = por %p141_p13, %p55_p8 }
  0x16   : > { %p465_p5 = scmp.lt.s32.totalorder %s666_s17, 2  ;;  %p770_p7 = por %p147_p2, %p61_p10 }
  0x17   : > { %s768_s8 = scalar_select %p46_p0, %s654_s14, %s48_s30  }
  0x18   : > { %s191_s10 = sand.u32 1, %s654_s14   ;;  %s434_s20 = sshll.u32 %s662_s16, 3 }
  0x19   : > { %s433_s11 = sshll.u32 %s191_s10, 3  ;;  %s200_s18 = scalar_lea.hbm %s837_s0, %s434_s20 }
  0x1a   : > { %s195_s24 = scalar_lea.vmem [#allocation3], %s433_s11  ;;  %s202_s26 = sshll.u32 %s200_s18, 4  ;;  %s203_s26 = int_to_ptr.hbm [resolvable:$true] %s202_s26 }
  0x1b   : > { %s204_s25 = sshll.u32 %s195_s24, 4  ;;  %p457_p8 = pnand %p465_p5, %p750_p11  ;;  %s205_s25 = int_to_ptr.vmem [resolvable:$true] %s204_s25 }
  0x1c   : > { %s192_s27 = scalar_lea.sflag [#allocation4], %s191_s10  ;;  %213 = sbr.rel (%p731_p3) target bundleno = 175 (0xaf), region = 32 }
  0x1d   : > { %459 = dma.hbm_to_vmem [thread:$0]  (!%p457_p8), %s203_s26, 128, %s205_s25, %s192_s27  }
  0x1e   : > { %s784_s28 = sand.u32 (!%p731_p3), 1, %s650_s13  }
  0x1f   : > { %s436_s30 = sshll.u32 (!%p731_p3), %s784_s28, 3  ;;  %s216_s6 = scalar_lea.sflag (!%p731_p3), [#allocation4], %s784_s28 }
  0x20   : > { %s219_s11 = scalar_lea.vmem (!%p731_p3), [#allocation3], %s436_s30 }
  0x21   : > { %633 = dma.done.wait (%p756_p12), %s216_s6, 128  }
  0x22   : > { %635 = vsyncadd (%p756_p12), %s216_s6, 4294967168 }
  0x23   : > { %637 = dma.done.wait (%p723_p1), [#allocation7], 512  }
  0x24   : > { %639 = vsyncadd (%p723_p1), [#allocation7], 4294966784  ;;  %v269_v0 = vld [vmem:[#allocation6 + $0x18] sm:$0xff]  ;;  %v268_v1 = vld [vmem:[#allocation6 + $0x10] sm:$0xff]  ;;  %vm270_vm0 = vcmask 261120   ;;  %s441_s23 = sshll.u32 %s658_s15, 3 }
  0x25   : > { %286 = vmatpush.msra.mxu0 %v269_v0  ;;  %v267_v2 = vld [vmem:[#allocation6 + $0x8] sm:$0xff]  ;;  %v266_v3 = vld [vmem:[#allocation6] sm:$0xff]  ;;  %v265_v4 = vld [vmem:[%s219_s11] sm:$0xff]  ;;  %s313_s19 = scalar_lea.hbm %s840_s3, %s441_s23  ;;  %s250_s21 = scalar_lea.vmem [#allocation8], %s436_s30 }
  0x26   : > { %v519_v5 = vld [vmem:[%s839_s2] ss:$0 sm:$0xff]  ;;  %s315_s22 = sshll.u32 %s250_s21, 4  ;;  %s317_s18 = sshll.u32 %s313_s19, 4  ;;  %s316_s22 = int_to_ptr.vmem [resolvable:$true] %s315_s22  ;;  %s318_s18 = int_to_ptr.hbm [resolvable:$true] %s317_s18 }
  0x27   : > { %287 = vmatpush.msra.mxu0 %v268_v1  ;;  %s302_s24 = scalar_lea.sflag [#allocation5], %s784_s28  ;;  %s594_s25 = sshra.s32 %s318_s18, 4  ;;  %s595_s25 = int_to_ptr.hbm [resolvable:$true] %s594_s25 }
  0x28   : > { %s596_s15 = scalar_lea.hbm %s595_s25, 8  ;;  %s600_s6 = scalar_lea.hbm %s840_s3, 16 }
  0x29   : > { %288 = vmatpush.msra.mxu0 %v267_v2  ;;  %p597_p1 = scmp.ne.s32.totalorder %s595_s25, %s596_s15  ;;  %p601_p10 = scmp.lt.s32.totalorder %s595_s25, %s840_s3 }
  0x2a   : > { %p602_p11 = scmp.lt.s32.totalorder %s600_s6, %s596_s15 }
  0x2b   : > { %289 = vmatpush.msra.mxu0 %v266_v3  ;;  %p598_p3 = pnand %p597_p1, %p762_p4 }
  0x2c   : > { %439 = vmatmul.msk.f32.vlgmr.msra.gmra.mxu0 %vm270_vm0, %v265_v4  ;;  %p603_p12 = por %p602_p11, %p601_p10 }
  0x2d   : > { %p599_p9 = pneg %p598_p3 }
  0x2f   : > { %p604_p13 = pnand %p603_p12, %p599_p9 }
  0xa9   : > { %v291_v6 = vpop.f32.mrf.mxu0 }
  0xaa   : > { %v294_v7 = vadd.f32 %v519_v5, %v291_v6 }
  0xac   : > { %300 = vst [vmem:[%s250_s21] sm:$0xff] %v294_v7 }
  0xad   : > { %607 = shalt.err (!%p604_p13)
}
  0xae   : > { %450 = dma.vmem_to_hbm [thread:$0]  (%p762_p4), %s316_s22, 128, %s318_s18, %s302_s24  }
  0xaf PF: > { %s329_s28 = sand.u32 1, %s646_s12   ;;  %p461_p0 = pnand %p432_p6, %p770_p7 }
  0xb0   : > { %s330_s23 = scalar_lea.sflag [#allocation5], %s329_s28 }
  0xb1   : > { %p462_p2 = pneg %p461_p0 }
  0xb3   : > { %641 = dma.done.wait (%p462_p2), %s330_s23, 128  }
  0xb4   : > { %643 = vsyncadd (%p462_p2), %s330_s23, 4294967168  ;;  %s20_s17 = sadd.s32 1, %s666_s17   ;;  %s847_s12 = smov %s650_s13 }
  0xb5   : > { %p17_p5 = scmp.ge.s32.totalorder %s20_s17, 4   ;;  %s848_s13 = smov %s654_s14 }
  0xb6   : > { %s849_s14 = smov %s768_s8  ;;  %s850_s15 = smov %s662_s16 }
  0xb7   : > { %s851_s16 = smov %s853_s29  ;;  %19 = sbr.rel (!%p17_p5) target bundleno = 7 (0x7), region = 93 }
  0xbc   :  { %336 = vsyncpa [#allocation4], 1 }
  0xbd   :  { %338 = vsyncpa [#allocation4 + $0x1], 1 }
  0xbe   :  { %339 = vsyncpa [#allocation7], 1 }
  0xbf   :  { %340 = vsyncpa [#allocation5], 1 }
  0xc0   :  { %342 = vsyncpa [#allocation5 + $0x1], 1 }

</bundles_post_ra>
